<compile_context>
chip_gen: v5e
topology: v5e:2x2
jax: 0.10.0
libtpu: 0.0.40
codegen_flags: <defaults>
</compile_context>

<pallas_src>
import math

import jax
import jax.numpy as jnp
from jax.experimental import pallas as pl
from jax.experimental.pallas import tpu as pltpu

_LANE = 128
_BLOCK_ROWS = 1024                 # (1024, 128) f32 block = 512 KiB per buffer
_N_SPLIT = 2                       # outer "parallel" axis (both TCs on v7x)
_VMEM_LIMIT = 32 * 1024 * 1024     # explicit scoped-VMEM cap, safe on v5e/v6e/v7x


# ------------------------------ layout helpers -------------------------------

def _rows_view(x, pad_value):
    """Flatten to (rows, 128) f32.  Pads (with a neutral value) only when the
    element count is not a multiple of 128; typical NCHW sizes reshape free."""
    flat = jnp.ravel(x).astype(jnp.float32)
    n = flat.shape[0]
    rem = n % _LANE
    if rem:
        flat = jnp.pad(flat, (0, _LANE - rem), constant_values=pad_value)
    return flat.reshape(-1, _LANE)


def _reduce_plan(rows):
    """Static tiling plan for a (rows, 128) reduction."""
    block_rows = rows if rows <= _BLOCK_ROWS else _BLOCK_ROWS
    nb = pl.cdiv(rows, block_rows)
    n_split = _N_SPLIT if nb >= _N_SPLIT else 1
    bps = pl.cdiv(nb, n_split)               # blocks per split
    needs_mask = (n_split * bps * block_rows) != rows
    return block_rows, nb, n_split, bps, needs_mask


# ------------------------------ Pallas kernels --------------------------------

def _make_sq_diff_kernel(rows, block_rows, bps, needs_mask):
    """sum((a-b)^2) with a block-shaped vector accumulator + tail masking."""
    def kernel(a_ref, b_ref, o_ref, acc_ref):
        c = pl.program_id(0)
        i = pl.program_id(1)

        @pl.when(i == 0)
        def _():
            acc_ref[...] = jnp.zeros_like(acc_ref)

        d = a_ref[...] - b_ref[...]
        if needs_mask:
            row0 = (c * bps + i) * block_rows
            ridx = jax.lax.broadcasted_iota(jnp.int32, (block_rows, _LANE), 0)
            d = jnp.where(ridx + row0 < rows, d, 0.0)
        acc_ref[...] += d * d

        @pl.when(i == pl.num_programs(1) - 1)
        def _():
            part = jnp.sum(acc_ref[...], axis=0, keepdims=True)     # (1, 128)
            sub = jax.lax.broadcasted_iota(jnp.int32, (8, _LANE), 0)
            o_ref[...] = jnp.where(sub == 0, part, 0.0)
    return kernel


def _make_log_sum_kernel(rows, block_rows, bps, needs_mask):
    """sum(log(x)) with a block-shaped vector accumulator + tail masking."""
    def kernel(x_ref, o_ref, acc_ref):
        c = pl.program_id(0)
        i = pl.program_id(1)

        @pl.when(i == 0)
        def _():
            acc_ref[...] = jnp.zeros_like(acc_ref)

        x = x_ref[...]
        if needs_mask:
            row0 = (c * bps + i) * block_rows
            ridx = jax.lax.broadcasted_iota(jnp.int32, (block_rows, _LANE), 0)
            x = jnp.where(ridx + row0 < rows, x, 1.0)   # log(1) == 0 for padding
        acc_ref[...] += jnp.log(x)

        @pl.when(i == pl.num_programs(1) - 1)
        def _():
            part = jnp.sum(acc_ref[...], axis=0, keepdims=True)     # (1, 128)
            sub = jax.lax.broadcasted_iota(jnp.int32, (8, _LANE), 0)
            o_ref[...] = jnp.where(sub == 0, part, 0.0)
    return kernel


def _heads_kernel(real_s_ref, fake_s_ref, real_c_ref, fake_c_ref, label_ref, o_ref):
    """Fused discriminator-head sums (single small block, lane-dense output):
       lane0: sum softplus(-real_s)   (BCE vs ones,  real S)
       lane1: sum softplus( fake_s)   (BCE vs zeros, fake S)
       lane2: sum softplus(-fake_s)   (BCE vs ones,  fake S)
       lane3: sum CE(real_c, label)
       lane4: sum CE(fake_c, label)"""
    def softplus(x):
        return jnp.maximum(x, 0.0) + jnp.log1p(jnp.exp(-jnp.abs(x)))

    rs = real_s_ref[...]
    fs = fake_s_ref[...]
    log_term_fake = jnp.log1p(jnp.exp(-jnp.abs(fs)))   # shared between the 2 fake sums
    s_real_ones = jnp.sum(softplus(-rs))
    s_fake_zeros = jnp.sum(jnp.maximum(fs, 0.0) + log_term_fake)
    s_fake_ones = jnp.sum(jnp.maximum(-fs, 0.0) + log_term_fake)

    label = label_ref[...]                              # (N, 1) int32

    def ce_sum(logits):
        m = jnp.max(logits, axis=-1, keepdims=True)
        lse = m + jnp.log(jnp.sum(jnp.exp(logits - m), axis=-1, keepdims=True))
        cls = jax.lax.broadcasted_iota(jnp.int32, logits.shape, 1)
        picked = jnp.sum(jnp.where(cls == label, logits, 0.0),
                         axis=-1, keepdims=True)
        return jnp.sum(lse - picked)

    ce_real = ce_sum(real_c_ref[...])
    ce_fake = ce_sum(fake_c_ref[...])

    lane = jax.lax.broadcasted_iota(jnp.int32, (1, _LANE), 1)
    o_ref[...] = (jnp.where(lane == 0, s_real_ones, 0.0)
                  + jnp.where(lane == 1, s_fake_zeros, 0.0)
                  + jnp.where(lane == 2, s_fake_ones, 0.0)
                  + jnp.where(lane == 3, ce_real, 0.0)
                  + jnp.where(lane == 4, ce_fake, 0.0))


# -------------------------------- wrappers ------------------------------------

def _tiled_sum(kernel, tiles, block_rows, nb, n_split, bps):
    last_block = nb - 1

    if n_split * bps == nb:                     # exact split -> affine index map
        def in_map(c, i):
            return (c * bps + i, 0)
    else:                                       # clamp; masked in-kernel
        def in_map(c, i):
            return (jnp.minimum(c * bps + i, last_block), 0)

    out = pl.pallas_call(
        kernel,
        out_shape=jax.ShapeDtypeStruct((8 * n_split, _LANE), jnp.float32),
        grid_spec=pltpu.PrefetchScalarGridSpec(
            num_scalar_prefetch=0,
            grid=(n_split, bps),
            in_specs=[pl.BlockSpec((block_rows, _LANE), in_map) for _ in tiles],
            out_specs=pl.BlockSpec((8, _LANE), lambda c, i: (c, 0)),
            scratch_shapes=[pltpu.VMEM((block_rows, _LANE), jnp.float32)],
        ),
        compiler_params=pltpu.CompilerParams(
            dimension_semantics=("parallel", "arbitrary"),
            vmem_limit_bytes=_VMEM_LIMIT),
    )(*tiles)
    return jnp.sum(out)


def sq_diff_sum(a, b):
    ta = _rows_view(a, 0.0)
    tb = _rows_view(b, 0.0)
    rows = ta.shape[0]
    block_rows, nb, n_split, bps, needs_mask = _reduce_plan(rows)
    kernel = _make_sq_diff_kernel(rows, block_rows, bps, needs_mask)
    return _tiled_sum(kernel, [ta, tb], block_rows, nb, n_split, bps)


def log_sum(x):
    t = _rows_view(x, 1.0)
    rows = t.shape[0]
    block_rows, nb, n_split, bps, needs_mask = _reduce_plan(rows)
    kernel = _make_log_sum_kernel(rows, block_rows, bps, needs_mask)
    return _tiled_sum(kernel, [t], block_rows, nb, n_split, bps)


def discriminator_head_sums(d_real_s, d_fake_s, d_real_c, d_fake_c, label):
    """One fused pallas_call for the small discriminator-head tensors.
    Sized for class-logit + scalar-S discriminator heads; very large patch
    discriminator S-outputs should be routed through the tiled reduction path."""
    rs = d_real_s.astype(jnp.float32).reshape(d_real_s.shape[0], -1)
    fs = d_fake_s.astype(jnp.float32).reshape(d_fake_s.shape[0], -1)
    rc = d_real_c.astype(jnp.float32)
    fc = d_fake_c.astype(jnp.float32)
    lab = label.astype(jnp.int32).reshape(-1, 1)
    out = pl.pallas_call(
        _heads_kernel,
        out_shape=jax.ShapeDtypeStruct((1, _LANE), jnp.float32),
    )(rs, fs, rc, fc, lab)
    return out[0]


def rate_distortion_classification_loss(out_generator, out_real, out_fake,
                                        target, label, nu=1.0):
    """Mirrors RateDistortionClassificationLoss.forward (metric='mse')."""
    n, _, h, w = target.shape
    num_pixels = n * h * w

    # bpp_loss = sum_l sum(log(likelihoods_l)) / (-ln2 * num_pixels)
    log_total = jnp.float32(0.0)
    for lk in out_generator["likelihoods"].values():
        log_total = log_total + log_sum(lk)
    bpp_loss = log_total / (-math.log(2) * num_pixels)

    d_real_s, d_real_c = out_real
    d_fake_s, d_fake_c = out_fake

    sums = discriminator_head_sums(d_real_s, d_fake_s, d_real_c, d_fake_c, label)
    d_s_real = sums[0] / d_real_s.size   # BCE(real_s, ones)  mean
    d_s_fake = sums[1] / d_fake_s.size   # BCE(fake_s, zeros) mean
    g_s_fake = sums[2] / d_fake_s.size   # BCE(fake_s, ones)  mean
    d_c_real = sums[3] / d_real_c.shape[0]
    g_c_fake = sums[4] / d_fake_c.shape[0]

    d_l = 0.5 * (d_s_real + d_s_fake) + nu * d_c_real

    g_m = sq_diff_sum(out_generator["x_hat"], target) / target.size  # MSE mean

    g_l = 0.005 * (255.0 ** 2) * g_m + bpp_loss + 0.0001 * (g_s_fake + g_c_fake)
    loss = g_l + d_l
    return d_l, g_l, bpp_loss, g_m, loss

# TODO(synk): metric='ms-ssim' branch of the module is not implemented (mse only).


# ------------------------------ pure-JAX reference ----------------------------

def _reference(out_generator, out_real, out_fake, target, label, nu=1.0):
    n, _, h, w = target.shape
    num_pixels = n * h * w
    bpp = sum(jnp.sum(jnp.log(v)) / (-math.log(2) * num_pixels)
              for v in out_generator["likelihoods"].values())

    def bce_mean(x, t):
        return jnp.mean(jnp.maximum(x, 0.0) - x * t
                        + jnp.log1p(jnp.exp(-jnp.abs(x))))

    def ce_mean(logits, lab):
        lse = jax.nn.logsumexp(logits, axis=-1)
        picked = jnp.take_along_axis(logits, lab[:, None], axis=-1)[:, 0]
        return jnp.mean(lse - picked)

    d_real_s, d_real_c = out_real
    d_fake_s, d_fake_c = out_fake
    d_s_real = bce_mean(d_real_s, jnp.ones_like(d_real_s))
    d_s_fake = bce_mean(d_fake_s, jnp.zeros_like(d_fake_s))
    d_c_real = ce_mean(d_real_c, label)
    d_l = 0.5 * (d_s_real + d_s_fake) + nu * d_c_real
    g_m = jnp.mean((out_generator["x_hat"] - target) ** 2)
    g_s_fake = bce_mean(d_fake_s, jnp.ones_like(d_fake_s))
    g_c_fake = ce_mean(d_fake_c, label)
    g_l = 0.005 * (255.0 ** 2) * g_m + bpp + 0.0001 * (g_s_fake + g_c_fake)
    return d_l, g_l, bpp, g_m, g_l + d_l


# ----------------------------------- main --------------------------------------

if __name__ == "__main__":
    key = jax.random.PRNGKey(0)
    ks = jax.random.split(key, 9)
    N, C, H, W = 2, 3, 16, 16
    NUM_CLASSES = 10

    target = jax.random.uniform(ks[0], (N, C, H, W), jnp.float32)
    x_hat = jnp.clip(target + 0.05 * jax.random.normal(ks[1], (N, C, H, W),
                                                       jnp.float32), 0.0, 1.0)
    lik_y = jax.random.uniform(ks[2], (N, 4, 8, 8), jnp.float32, 1e-3, 1.0)
    lik_z = jax.random.uniform(ks[3], (N, 4, 4, 4), jnp.float32, 1e-3, 1.0)
    d_real_s = jax.random.normal(ks[4], (N, 1), jnp.float32)
    d_fake_s = jax.random.normal(ks[5], (N, 1), jnp.float32)
    d_real_c = jax.random.normal(ks[6], (N, NUM_CLASSES), jnp.float32)
    d_fake_c = jax.random.normal(ks[7], (N, NUM_CLASSES), jnp.float32)
    label = jax.random.randint(ks[8], (N,), 0, NUM_CLASSES)

    out_generator = {"x_hat": x_hat, "likelihoods": {"y": lik_y, "z": lik_z}}
    out_real = (d_real_s, d_real_c)
    out_fake = (d_fake_s, d_fake_c)

    outs = rate_distortion_classification_loss(
        out_generator, out_real, out_fake, target, label)
    outs = jax.block_until_ready(outs)

    refs = _reference(out_generator, out_real, out_fake, target, label)
    names = ("D_L", "G_L", "bpp_loss", "G_M", "loss")
    for name, got, ref in zip(names, outs, refs):
        if not jnp.allclose(got, ref, rtol=1e-4, atol=1e-4):
            raise AssertionError(f"{name}: pallas={got} ref={ref}")

    print("KERNEL_OK")
</pallas_src>

<mosaic_0001>
module attributes {stable_mosaic.version = 11 : i64} {
  func.func @kernel(%arg0: i32, %arg1: i32, %arg2: memref<4x128xf32, #tpu.memory_space<vmem>>, %arg3: memref<8x128xf32, #tpu.memory_space<vmem>>, %arg4: memref<4x128xf32, #tpu.memory_space<vmem>>) attributes {dimension_semantics = [#tpu.dimension_semantics<parallel>, #tpu.dimension_semantics<arbitrary>], iteration_bounds = array<i64: 1, 1>, scalar_prefetch = 0 : i64, scratch_operands = 1 : i64, tpu.core_type = #tpu.core_type<tc>, window_params = [{transform_indices = @transform_0, window_bounds = array<i64: 4, 128>}, {transform_indices = @transform_1, window_bounds = array<i64: 8, 128>}]} {
    %c0_i32 = arith.constant 0 : i32
    %0 = arith.cmpi eq, %arg1, %c0_i32 : i32
    %1 = arith.extui %0 : i1 to i32
    %c0_i32_0 = arith.constant 0 : i32
    %2 = arith.cmpi ne, %1, %c0_i32_0 : i32
    scf.if %2 {
      %cst = arith.constant 0.000000e+00 : f32
      %11 = vector.broadcast %cst : f32 to vector<4x128xf32>
      %c0_8 = arith.constant 0 : index
      %c0_9 = arith.constant 0 : index
      %12 = vector.load %arg4[%c0_8, %c0_9] : memref<4x128xf32, #tpu.memory_space<vmem>>, vector<4x128xf32>
      tpu.vector_store %arg4[%c0_8, %c0_9], %11 {strides = array<i32>} : memref<4x128xf32, #tpu.memory_space<vmem>>, vector<4x128xf32>,
    } else {
    }
    %c0 = arith.constant 0 : index
    %c0_1 = arith.constant 0 : index
    %3 = vector.load %arg2[%c0, %c0_1] : memref<4x128xf32, #tpu.memory_space<vmem>>, vector<4x128xf32>
    %c0_2 = arith.constant 0 : index
    %c0_3 = arith.constant 0 : index
    %4 = vector.load %arg4[%c0_2, %c0_3] : memref<4x128xf32, #tpu.memory_space<vmem>>, vector<4x128xf32>
    %5 = math.log %3 : vector<4x128xf32>
    %6 = arith.addf %4, %5 : vector<4x128xf32>
    %c0_4 = arith.constant 0 : index
    %c0_5 = arith.constant 0 : index
    %7 = vector.load %arg4[%c0_4, %c0_5] : memref<4x128xf32, #tpu.memory_space<vmem>>, vector<4x128xf32>
    tpu.vector_store %arg4[%c0_4, %c0_5], %6 {strides = array<i32>} : memref<4x128xf32, #tpu.memory_space<vmem>>, vector<4x128xf32>,
    %c0_i32_6 = arith.constant 0 : i32
    %8 = arith.cmpi eq, %arg1, %c0_i32_6 : i32
    %9 = arith.extui %8 : i1 to i32
    %c0_i32_7 = arith.constant 0 : i32
    %10 = arith.cmpi ne, %9, %c0_i32_7 : i32
    scf.if %10 {
      %c0_8 = arith.constant 0 : index
      %c0_9 = arith.constant 0 : index
      %11 = vector.load %arg4[%c0_8, %c0_9] : memref<4x128xf32, #tpu.memory_space<vmem>>, vector<4x128xf32>
      %cst = arith.constant dense<0.000000e+00> : vector<128xf32>
      %12 = vector.multi_reduction <add>, %11, %cst [0] : vector<4x128xf32> to vector<128xf32>
      %13 = vector.shape_cast %12 : vector<128xf32> to vector<1x128xf32>
      %14 = tpu.iota {dimensions = array<i32: 0>} : vector<8x128xi32>
      %c0_i32_10 = arith.constant 0 : i32
      %15 = vector.broadcast %c0_i32_10 : i32 to vector<8x128xi32>
      %16 = arith.cmpi eq, %14, %15 : vector<8x128xi32>
      %cst_11 = arith.constant 0.000000e+00 : f32
      %17 = vector.shape_cast %13 : vector<1x128xf32> to vector<1x128xf32>
      %18 = vector.broadcast %17 : vector<1x128xf32> to vector<8x128xf32>
      %19 = vector.broadcast %cst_11 : f32 to vector<8x128xf32>
      %20 = arith.select %16, %18, %19 : vector<8x128xi1>, vector<8x128xf32>
      %c0_12 = arith.constant 0 : index
      %c0_13 = arith.constant 0 : index
      %21 = vector.load %arg3[%c0_12, %c0_13] : memref<8x128xf32, #tpu.memory_space<vmem>>, vector<8x128xf32>
      tpu.vector_store %arg3[%c0_12, %c0_13], %20 {strides = array<i32>} : memref<8x128xf32, #tpu.memory_space<vmem>>, vector<8x128xf32>,
    } else {
    }
    return
  }
  func.func @transform_0(%arg0: i32, %arg1: i32) -> (i32, i32) {
    %c1_i32 = arith.constant 1 : i32
    %0 = arith.muli %arg0, %c1_i32 : i32
    %1 = arith.addi %0, %arg1 : i32
    %c0_i32 = arith.constant 0 : i32
    %c0_i32_0 = arith.constant 0 : i32
    return %1, %c0_i32 : i32, i32
  }
  func.func @transform_1(%arg0: i32, %arg1: i32) -> (i32, i32) {
    %c0_i32 = arith.constant 0 : i32
    %c0_i32_0 = arith.constant 0 : i32
    return %arg0, %c0_i32 : i32, i32
  }
}

</mosaic_0001>

<bundles_post_ra>
// kernel: tpu_custom_call.1
= control target key start
LH: loop header
LB: loop body
LE: loop exit
PB: predicated region body
PF: predicated region fallthrough
CT: control target
= control target key end

     0   :  { %6 = vsyncpa [#allocation4], 0  ;;  %s148_s0 = inlined_call_operand.hbm [shape: f32[4,128], index: 0, kind: input, shape index: {}]   ;;  %s149_s1 = inlined_call_operand.hbm [shape: f32[8,128], index: 1, kind: output, shape index: {}]  }
   0x1   :  { %7 = vsyncpa [#allocation5], 0  ;;  %s16_s8 = sshll.u32 %s148_s0, 4  ;;  %s129_s9 = smov [#allocation3]   ;;  %s17_s8 = int_to_ptr.hbm [resolvable:$true] %s16_s8 }
   0x2   :  { %s18_s10 = sshll.u32 %s129_s9, 4  ;;  %s19_s10 = int_to_ptr.vmem [resolvable:$true] %s18_s10 }
   0x3   :  { %21 = dma.hbm_to_vmem [thread:$0]  %s17_s8, 64, %s19_s10, [#allocation4]  }
   0x4   :  { %125 = dma.done.wait [#allocation4], 64  }
   0x5   :  { %126 = vsyncadd [#allocation4], 4294967232  ;;  %v130_v0 = vmov 0.0   ;;  %v32_v1 = vld [vmem:[#allocation3] sm:$0xf]  ;;  %vm42_vm0 = vcmask 1043456   ;;  %v50_v9 = vlaneseq }
   0x6   :  { %31 = vst [vmem:[#allocation2] sm:$0xf] %v130_v0  ;;  %75 = vlog2.f32 %v32_v1  ;;  %s131_s0 = smov [#allocation6]   ;;  %s62_s14 = sshll.u32 %s149_s1, 4  ;;  %s63_s14 = int_to_ptr.hbm [resolvable:$true] %s62_s14 }
   0x7   :  { %v51_v12 = vshrl.u32 %v50_v9, 7  ;;  %s60_s11 = sshll.u32 %s131_s0, 4  ;;  %s61_s11 = int_to_ptr.vmem [resolvable:$true] %s60_s11 }
   0x9   :  { %vm52_vm1 = vcmp.eq.s32.totalorder %v51_v12, 0 }
   0xc   :  { %v76_v2 = vpop.eup %75 }
   0xd   :  { %v33_v3 = vld [vmem:[#allocation2] sm:$0xf]  ;;  %v35_v4 = vmul.f32 0.6931472, %v76_v2 }
   0xf   :  { %v36_v5 = vadd.f32 %v35_v4, %v33_v3 }
  0x11   :  { %37 = vst [vmem:[#allocation2] sm:$0xf] %v36_v5 }
  0x18   :  { %v41_v6 = vld [vmem:[#allocation2] sm:$0xf] }
  0x19   :  { %v43_v7 = vsel %vm42_vm0, %v41_v6, 0.0 }
  0x1a   :  { %v44_v8 = vrot.slane %v43_v7, 4 }
  0x1c   :  { %v45_v10 = vadd.f32 %v44_v8, %v43_v7 }
  0x1e   :  { %v46_v11 = vrot.slane %v45_v10, 2 }
  0x20   :  { %v47_v13 = vadd.f32 %v46_v11, %v45_v10 }
  0x22   :  { %v48_v14 = vrot.slane %v47_v13, 1 }
  0x24   :  { %v49_v15 = vadd.f32 %v48_v14, %v47_v13 }
  0x26   :  { %v53_v16 = vsel %vm52_vm1, %v49_v15, 0.0 }
  0x27   :  { %54 = vst [vmem:[#allocation6] sm:$0xff] %v53_v16 }
  0x28   :  { %65 = dma.vmem_to_hbm [thread:$0]  %s61_s11, 128, %s63_s14, [#allocation5]  }
  0x29   :  { %127 = dma.done.wait [#allocation5], 128  }
  0x2a   :  { %128 = vsyncadd [#allocation5], 4294967168 }
  0x2b   :  { %70 = vsyncpa [#allocation4], 1 }
  0x2c   :  { %71 = vsyncpa [#allocation5], 1 }

</bundles_post_ra>
